<compile_context>
chip_gen: v7x
topology: tpu7x:2x2x1
jax: 0.10.0
libtpu: 0.0.40
codegen_flags: <defaults>
</compile_context>

<pallas_src>
import functools

import jax
import jax.numpy as jnp
from jax.experimental import pallas as pl
from jax.experimental.pallas import tpu as pltpu


def _round_up(x, m):
    return ((x + m - 1) // m) * m


def _resident_spec(block_shape):
    """BlockSpec for an operand whose block never changes across the grid.

    Requests single-buffering (the operand is DMA'd once and stays resident in
    VMEM); falls back to the default double-buffered spec if this jax version
    does not accept `pipeline_mode`.
    """
    index_map = lambda i: (0,) * len(block_shape)
    try:
        return pl.BlockSpec(block_shape, index_map,
                            pipeline_mode=pl.Buffered(1))
    except (TypeError, ValueError):
        return pl.BlockSpec(block_shape, index_map)


def patch_embed_kernel(p_ref, w_ref, b_ref, o_ref):
    # p_ref: (tm, K) patch tile streaming over M; w_ref: (K, dim) resident
    # projection; b_ref: (1, dim) f32 bias; o_ref: (tm, dim) output tile.
    acc = jnp.dot(p_ref[...], w_ref[...], preferred_element_type=jnp.float32)
    o_ref[...] = (acc + b_ref[...]).astype(o_ref.dtype)


def patch_embedding(x, weight, bias, patch_size, *, block_m=1024,
                    compute_dtype=jnp.bfloat16, out_dtype=None):
    """Conv2d(C, dim, kernel=stride=P) + flatten(2).transpose(1, 2).

    x: (B, C, H, W) NCHW; weight: (dim, C, P, P); bias: (dim,).
    Returns (B, num_patches, dim) in `out_dtype` (default: compute_dtype).
    """
    B, C, H, W = x.shape
    P = patch_size
    dim = weight.shape[0]
    nh, nw = H // P, W // P
    num_patches = nh * nw
    M, K = B * num_patches, C * P * P
    if out_dtype is None:
        out_dtype = compute_dtype

    # Patch extraction: per-patch flatten order (C, ph, pw) matches Conv2d's
    # weight reduction order.  Under jit the transpose+reshape+cast collapse
    # into a single HBM copy (no pad ops: K and dim keep their natural
    # extents, which full-extent BlockSpec dims allow).
    patches = x.reshape(B, C, nh, P, nw, P)
    patches = patches.transpose(0, 2, 4, 1, 3, 5).reshape(M, K)
    patches = patches.astype(compute_dtype)

    w2 = weight.reshape(dim, K).T.astype(compute_dtype)   # (K, dim)
    b2 = bias.reshape(1, dim).astype(jnp.float32)          # f32 bias add

    # M tiling: multiples of 16 (bf16 sublane packing => unmasked stores on
    # all but a possible ragged last tile), and at least two grid steps when
    # M allows it so v7x's two TensorCores both get work under
    # dimension_semantics=("parallel",).
    if M <= 16:
        tm = M
    else:
        tm = min(block_m, _round_up(pl.cdiv(M, 2), 16))
    grid_m = pl.cdiv(M, tm)

    # Generation-aware VMEM limit: ~3/4 of physical (48 MiB on v7x's 64 MiB,
    # 96 MiB on v5e/v6e's 128 MiB); conservative 32 MiB if the query fails.
    try:
        vmem_cap = pltpu.get_tpu_info().vmem_capacity_bytes
        vmem_limit = int(min((vmem_cap * 3) // 4, 96 * 1024 * 1024))
    except Exception:
        vmem_limit = 32 * 1024 * 1024

    cost = pl.CostEstimate(
        flops=2 * M * K * dim,
        transcendentals=0,
        bytes_accessed=(M * K + K * dim) * jnp.dtype(compute_dtype).itemsize
        + dim * 4
        + M * dim * jnp.dtype(out_dtype).itemsize,
    )

    out = pl.pallas_call(
        patch_embed_kernel,
        out_shape=jax.ShapeDtypeStruct((M, dim), out_dtype),
        grid=(grid_m,),
        in_specs=[
            pl.BlockSpec((tm, K), lambda i: (i, 0)),   # patch tiles stream over M
            _resident_spec((K, dim)),                  # weight: resident, single-buffered
            _resident_spec((1, dim)),                  # bias: resident, single-buffered
        ],
        out_specs=pl.BlockSpec((tm, dim), lambda i: (i, 0)),
        compiler_params=pltpu.CompilerParams(
            dimension_semantics=("parallel",),
            vmem_limit_bytes=vmem_limit,
        ),
        cost_estimate=cost,
    )(patches, w2, b2)

    # flatten(2).transpose(1, 2) in PyTorch == (B, num_patches, dim) here.
    return out.reshape(B, num_patches, dim)


if __name__ == "__main__":
    key = jax.random.PRNGKey(0)
    k1, k2, k3 = jax.random.split(key, 3)

    image_size, patch_size, dim = 16, 4, 32
    B, C = 2, 3
    num_patches = (image_size // patch_size) ** 2

    x = jax.random.normal(k1, (B, C, image_size, image_size), dtype=jnp.float32)

    # Deterministic Conv2d-style init (uniform in +-1/sqrt(fan_in)).
    fan_in = C * patch_size * patch_size
    bound = 1.0 / (fan_in ** 0.5)
    weight = jax.random.uniform(
        k2, (dim, C, patch_size, patch_size), minval=-bound, maxval=bound,
        dtype=jnp.float32)
    bias = jax.random.uniform(
        k3, (dim,), minval=-bound, maxval=bound, dtype=jnp.float32)

    def conv_ref(xr, wr):
        conv = jax.lax.conv_general_dilated(
            xr, wr, window_strides=(patch_size, patch_size), padding="VALID",
            dimension_numbers=("NCHW", "OIHW", "NCHW"))
        conv = conv + bias.reshape(1, dim, 1, 1)
        return conv.reshape(B, dim, -1).transpose(0, 2, 1)

    # 1) Exact-precision path (f32 compute, f32 output) vs Conv2d reference.
    fwd_f32 = jax.jit(functools.partial(
        patch_embedding, patch_size=patch_size,
        compute_dtype=jnp.float32, out_dtype=jnp.float32))
    out_f32 = jax.block_until_ready(fwd_f32(x, weight, bias))
    ref_f32 = conv_ref(x, weight)
    assert out_f32.shape == (B, num_patches, dim)
    assert jnp.allclose(out_f32, ref_f32, atol=1e-4, rtol=1e-4)

    # 2) Default fast path (bf16 compute / bf16 output, f32 accumulation)
    #    vs a bf16-cast reference.
    fwd = jax.jit(functools.partial(patch_embedding, patch_size=patch_size))
    out_bf16 = jax.block_until_ready(fwd(x, weight, bias))
    ref_bf16 = conv_ref(x.astype(jnp.bfloat16).astype(jnp.float32),
                        weight.astype(jnp.bfloat16).astype(jnp.float32))
    assert out_bf16.dtype == jnp.bfloat16
    assert out_bf16.shape == (B, num_patches, dim)
    assert jnp.allclose(out_bf16.astype(jnp.float32), ref_bf16,
                        atol=2e-2, rtol=2e-2)

    print("KERNEL_OK")
</pallas_src>

<mosaic_0001>
module attributes {stable_mosaic.version = 11 : i64} {
  func.func @patch_embed_kernel(%arg0: i32, %arg1: memref<16x48xf32, #tpu.memory_space<vmem>>, %arg2: memref<48x32xf32, #tpu.memory_space<vmem>>, %arg3: memref<1x32xf32, #tpu.memory_space<vmem>>, %arg4: memref<16x32xf32, #tpu.memory_space<vmem>>) attributes {dimension_semantics = [#tpu.dimension_semantics<parallel>], iteration_bounds = array<i64: 2>, scalar_prefetch = 0 : i64, scratch_operands = 0 : i64, tpu.core_type = #tpu.core_type<tc>, window_params = [{transform_indices = @transform_0, window_bounds = array<i64: 16, 48>}, {pipeline_mode = #tpu.pipeline_mode<synchronous>, transform_indices = @transform_1, window_bounds = array<i64: 48, 32>}, {pipeline_mode = #tpu.pipeline_mode<synchronous>, transform_indices = @transform_2, window_bounds = array<i64: 1, 32>}, {transform_indices = @transform_3, window_bounds = array<i64: 16, 32>}]} {
    %c0 = arith.constant 0 : index
    %c0_0 = arith.constant 0 : index
    %0 = vector.load %arg1[%c0, %c0_0] : memref<16x48xf32, #tpu.memory_space<vmem>>, vector<16x48xf32>
    %c0_1 = arith.constant 0 : index
    %c0_2 = arith.constant 0 : index
    %1 = vector.load %arg2[%c0_1, %c0_2] : memref<48x32xf32, #tpu.memory_space<vmem>>, vector<48x32xf32>
    %cst = arith.constant dense<0.000000e+00> : vector<16x32xf32>
    %2 = tpu.matmul %0, %1, %cst {dimension_numbers = #tpu.dot_dimension_numbers<[1], [0], [0], [1], [0, 0, 1, 1], [], []>} : vector<16x48xf32>, vector<48x32xf32>, vector<16x32xf32> -> vector<16x32xf32>
    %c0_3 = arith.constant 0 : index
    %c0_4 = arith.constant 0 : index
    %3 = vector.load %arg3[%c0_3, %c0_4] : memref<1x32xf32, #tpu.memory_space<vmem>>, vector<1x32xf32>
    %4 = vector.broadcast %3 : vector<1x32xf32> to vector<16x32xf32>
    %5 = arith.addf %2, %4 : vector<16x32xf32>
    %c0_5 = arith.constant 0 : index
    %c0_6 = arith.constant 0 : index
    %6 = vector.load %arg4[%c0_5, %c0_6] : memref<16x32xf32, #tpu.memory_space<vmem>>, vector<16x32xf32>
    tpu.vector_store %arg4[%c0_5, %c0_6], %5 {strides = array<i32>} : memref<16x32xf32, #tpu.memory_space<vmem>>, vector<16x32xf32>,
    return
  }
  func.func @transform_0(%arg0: i32) -> (i32, i32) {
    %c0_i32 = arith.constant 0 : i32
    %c0_i32_0 = arith.constant 0 : i32
    return %arg0, %c0_i32 : i32, i32
  }
  func.func @transform_1(%arg0: i32) -> (i32, i32) {
    %c0_i32 = arith.constant 0 : i32
    %c0_i32_0 = arith.constant 0 : i32
    %c0_i32_1 = arith.constant 0 : i32
    return %c0_i32, %c0_i32_0 : i32, i32
  }
  func.func @transform_2(%arg0: i32) -> (i32, i32) {
    %c0_i32 = arith.constant 0 : i32
    %c0_i32_0 = arith.constant 0 : i32
    %c0_i32_1 = arith.constant 0 : i32
    return %c0_i32, %c0_i32_0 : i32, i32
  }
  func.func @transform_3(%arg0: i32) -> (i32, i32) {
    %c0_i32 = arith.constant 0 : i32
    %c0_i32_0 = arith.constant 0 : i32
    return %arg0, %c0_i32 : i32, i32
  }
}

</mosaic_0001>

<bundles_post_ra>
// kernel: patch_embedding.1
= control target key start
LH: loop header
LB: loop body
LE: loop exit
PB: predicated region body
PF: predicated region fallthrough
CT: control target
= control target key end

     0   :  { %8 = vsyncpa [#allocation3], 0  ;;  %s650_s0 = inlined_call_operand.vmem [shape: f32[32,48], index: 0, kind: input, shape index: {}]   ;;  %s651_s1 = inlined_call_operand.vmem [shape: f32[48,32], index: 1, kind: input, shape index: {}]   ;;  %s652_s2 = inlined_call_operand.vmem [shape: f32[1,32], index: 2, kind: input, shape index: {}]   ;;  %s653_s3 = inlined_call_operand.hbm [shape: f32[32,32], index: 3, kind: output, shape index: {}]  }
   0x1   :  { %10 = vsyncpa [#allocation3 + $0x1], 0  ;;  %s527_s12 = smov 0   ;;  %s529_s13 = smov 0  }
   0x2   :  { %s531_s14 = smov 0   ;;  %s533_s15 = smov 0  }
   0x3 LB: > { %s548_s16 = sadd.s32 4294967295, %s502_s15   ;;  %s348_s17 = sadd.s32 4294967294, %s502_s15   ;;  %s502_s15 = sphi %s533_s15, %s659_s15   ;;  %s498_s14 = sphi %s531_s14, %s658_s14   ;;  %s494_s13 = sphi %s529_s13, %s657_s13   ;;  %s490_s12 = sphi %s527_s12, %s656_s12  }
   0x4   : > { %s552_s18 = sadd.s32 1, %s502_s15   ;;  %s91_s19 = sadd.s32 1, %s498_s14 }
   0x5   : > { %s88_s20 = ssub.s32 %s502_s15, %s552_s18  ;;  %p101_p0 = scmp.ne.s32.totalorder %s498_s14, %s494_s13 }
   0x6   : > { %p89_p1 = scmp.eq.s32.totalorder %s88_s20, 0  ;;  %p102_p2 = scmp.eq.s32.totalorder %s548_s16, 1 }
   0x7   : > { %p107_p3 = scmp.ne.s32.totalorder %s494_s13, %s490_s12  ;;  %p108_p4 = scmp.eq.s32.totalorder %s348_s17, 1 }
   0x8   : > { %s563_s21 = scalar_select %p89_p1, %s498_s14, %s91_s19  }
   0x9   : > { %p565_p5 = por %p102_p2, %p101_p0  ;;  %p569_p6 = por %p108_p4, %p107_p3 }
   0xa   : > { %p351_p7 = scmp.ge.s32.totalorder %s502_s15, 1  ;;  %p141_p8 = scmp.lt.s32.totalorder %s502_s15, 3 }
   0xc   : > { %p142_p9 = pnand %p351_p7, %p141_p8 }
   0xd   : > { %v174_v0 = vld [vmem:[%s651_s1] sm:$0xff] (!%p142_p9)  ;;  %v175_v1 = vld [vmem:[%s651_s1 + $0x8] sm:$0xff] (!%p142_p9)  ;;  %v176_v2 = vld [vmem:[%s651_s1 + $0x10] sm:$0xff] (!%p142_p9)  ;;  %s353_s30 = sshll.u32 (!%p142_p9), %s548_s16, 1  ;;  %vm187_vm0 = vcmask (!%p142_p9), 392192   ;;  %s162_s20 = sand.u32 (!%p142_p9), 1, %s494_s13  }
   0xe   : > { %145 = sbr.rel (%p142_p9) target bundleno = 258 (0x102), region = 32  ;;  %v387_v3 = vpack.c.bf16 (!%p142_p9), %v175_v1, %v174_v0  ;;  %v177_v4 = vld [vmem:[%s651_s1 + $0x18] sm:$0xff] (!%p142_p9)  ;;  %p166_p10 = scmp.lt.s32.totalorder (!%p142_p9), %s353_s30, 3  ;;  %v178_v6 = vld [vmem:[%s651_s1 + $0x20] sm:$0xff] (!%p142_p9)  ;;  %v179_v7 = vld [vmem:[%s651_s1 + $0x28] sm:$0xff] (!%p142_p9)  ;;  %vm269_vm1 = vcmask (!%p142_p9), 261120  }
   0xf   : > { %v391_v5 = vpack.c.bf16 (!%p142_p9), %v177_v4, %v176_v2  ;;  %v395_v8 = vpack.c.bf16 (!%p142_p9), %v179_v7, %v178_v6  ;;  %s352_s24 = sshll.u32 (!%p142_p9), %s162_s20, 4  ;;  %v355_v11 = vld [vmem:[%s652_s2] ss:$0 sm:$0xff] (!%p142_p9)  ;;  %s363_s29 = sshll.u32 (!%p142_p9), %s548_s16, 8 }
  0x10   : > { %388 = vmatprep.subr.bf16.mxu0 (!%p142_p9), %v387_v3  ;;  %s164_s27 = scalar_lea.vmem (!%p142_p9), [#allocation2], %s352_s24  ;;  %s607_s5 = scalar_lea.hbm (!%p142_p9), %s653_s3, %s363_s29 }
  0x11   : > { %390 = vmatpush3.bf16.msra.mxu0 (!%p142_p9), %v387_v3  ;;  %s286_s28 = sshll.u32 (!%p142_p9), %s164_s27, 4  ;;  %s609_s6 = scalar_lea.sflag (!%p142_p9), [#allocation3], %s162_s20  ;;  %s602_s28 = int_to_ptr.vmem [resolvable:$true] %s286_s28 }
  0x12   : > { %392 = vmatprep.subr.bf16.mxu0 (!%p142_p9), %v391_v5  ;;  %s440_s16 = scalar_lea.vmem (!%p142_p9), %s602_s28, 256  ;;  %s504_s7 = smov (!%p142_p9), [#allocation2]  }
  0x13   : > { %p441_p11 = scmp.ne.s32.totalorder (!%p142_p9), %s602_s28, %s440_s16  ;;  %s444_s8 = sshll.u32 (!%p142_p9), %s504_s7, 4  ;;  %s445_s8 = int_to_ptr.vmem [resolvable:$false] %s444_s8 }
  0x14   : > { %s446_s9 = scalar_lea.vmem (!%p142_p9), %s445_s8, 512  ;;  %p447_p0 = scmp.lt.s32.totalorder (!%p142_p9), %s602_s28, %s445_s8 }
  0x15   : > { %s661_s30 = smov (!%p166_p10, %s353_s30), 3  ;;  %394 = vmatpush3.bf16.msra.mxu0 %v391_v5  ;;  %p442_p12 = pnand %p441_p11, %p565_p5 }
  0x16   : > { %s354_s10 = sshll.u32 %s661_s30, 3  ;;  %396 = vmatprep.subr.bf16.mxu0 %v395_v8  ;;  %p448_p1 = scmp.lt.s32.totalorder %s446_s9, %s440_s16 }
  0x17   : > { %s169_s19 = scalar_lea.vmem %s650_s0, %s354_s10  ;;  %p443_p13 = pneg %p442_p12 }
  0x18   : > { %v172_v9 = vld [vmem:[%s169_s19] sm:$0xff]  ;;  %v173_v10 = vld [vmem:[%s169_s19 + $0x8] sm:$0xff]  ;;  %p449_p2 = por %p448_p1, %p447_p0 }
  0x19   : > { %384 = vmatprep.mubr.msk.f32.mxu0 %vm187_vm0, %v172_v9  ;;  %398 = vmatpush3.bf16.msra.mxu0 %v395_v8 }
  0x1a   : > { %p450_p3 = pnand %p449_p2, %p443_p13 }
  0x1c   : > { %385 = vmatmul.mubr.msk.f32.vlgmr.msra.gmra.mrb[0].mxu0 %vm187_vm0, %v173_v10 }
  0xef   : > { %v386_v12 = vpop.f32.mrb[0].mxu0 }
  0xf0   : > { %v266_v13 = vadd.f32 %v386_v12, %v355_v11  ;;  %v260_v14 = vpop.f32.mrb[1].mxu0 }
  0xf1   : > { %v261_v15 = vadd.f32 %v355_v11, %v260_v14 }
  0xf2   : > { %271 = vst.msk [vmem:[%s164_s27 + $0x8] sm:$0xff] %vm269_vm1, %v266_v13 }
  0xf3   : > { %270 = vst.msk [vmem:[%s164_s27] sm:$0xff] %vm269_vm1, %v261_v15 }
  0xf4   : > { %453 = shalt.err (!%p450_p3)
}
  0xf5   : > { %s454_s10 = scalar_lea.hbm %s607_s5, 256  ;;  %s458_s19 = scalar_lea.hbm %s653_s3, 512 }
  0xf6   : > { %p455_p4 = scmp.ne.s32.totalorder %s607_s5, %s454_s10  ;;  %p459_p9 = scmp.lt.u32.totalorder %s607_s5, %s653_s3 }
  0xf7   : > { %p460_p10 = scmp.lt.u32.totalorder %s458_s19, %s454_s10  ;;  %p462_p12 = scmp.lt.u32.totalorder %s454_s10, %s607_s5 }
  0xf8   : > { %p456_p7 = pnand %p455_p4, %p565_p5 }
  0xf9   : > { %p461_p11 = por %p460_p10, %p459_p9 }
  0xfa   : > { %p457_p8 = pneg %p456_p7 }
  0xfb   : > { %p463_p13 = por %p462_p12, %p461_p11 }
  0xfd   : > { %p464_p0 = pnand %p463_p13, %p457_p8 }
  0xff   : > { %467 = shalt.err (!%p464_p0)
}
 0x100   : > { %s505_s25 = smov 128   ;;  %s506_s26 = smov 8  }
 0x101   : > { %399 = dma.vmem_to_hbm [thread:$0]  (%p565_p5), %s602_s28, 256, %s607_s5, %s609_s6, %s505_s25, %s505_s25, %s506_s26  }
 0x102 PF: > { %p405_p1 = scmp.ge.s32.totalorder %s502_s15, 2  ;;  %s301_s27 = sand.u32 1, %s490_s12  }
 0x103   : > { %s302_s29 = scalar_lea.sflag [#allocation3], %s301_s27 }
 0x104   : > { %p402_p2 = pnand %p405_p1, %p569_p6 }
 0x106   : > { %485 = dma.done.wait (!%p402_p2), %s302_s29, 256  }
 0x107   : > { %487 = vsyncadd (!%p402_p2), %s302_s29, 4294967040  ;;  %p13_p3 = scmp.ge.s32.totalorder %s552_s18, 4   ;;  %s656_s12 = smov %s494_s13 }
 0x108   : > { %s657_s13 = smov %s498_s14  ;;  %s658_s14 = smov %s563_s21 }
 0x109   : > { %s659_s15 = smov %s552_s18  ;;  %15 = sbr.rel (!%p13_p3) target bundleno = 3 (0x3), region = 67 }
 0x110   :  { %307 = vsyncpa [#allocation3], 1 }
 0x111   :  { %309 = vsyncpa [#allocation3 + $0x1], 1 }

</bundles_post_ra>
